<compile_context>
chip_gen: v7x
topology: tpu7x:2x2x1
jax: 0.10.0
libtpu: 0.0.40
codegen_flags: <defaults>
</compile_context>

<pallas_src>
import functools

import jax
import jax.numpy as jnp
import numpy as np
from jax.experimental import pallas as pl
from jax.experimental.pallas import tpu as pltpu  # noqa: F401  (TPU backend assumed)


# ---------------------------------------------------------------------------
# Host-side constant builders (numpy, zero runtime cost).
# ---------------------------------------------------------------------------
def _tile_eye(inner, reps):
    # T[k, c*inner + k'] = 1 iff k == k'   ->  (x @ T)[i, c*inner + k] = x[i, k]
    return np.tile(np.eye(inner, dtype=np.float32), (1, reps))


def _block_expand(outer, inner):
    # E[c, c'*inner + k] = 1 iff c == c'   ->  (x @ E)[i, c*inner + k] = x[i, c]
    return np.kron(np.eye(outer, dtype=np.float32),
                   np.ones((1, inner), dtype=np.float32))


def _pad_rows_np(x, rows):
    return np.pad(x, ((0, rows - x.shape[0]), (0, 0)))


def _round_up(x, m):
    return ((x + m - 1) // m) * m


# ---------------------------------------------------------------------------
# Kernel: single invocation, whole batch.
# ---------------------------------------------------------------------------
def qriaffine_kernel(p_ref, c_ref, out_ref, *, N, L, Kp, CA):
    # p_ref : [4, N*L, Kp]   slices = (layer1+ones, h1, layer2+ones, h2),
    #                        each zero-padded on the feature axis to Kp.
    # c_ref : [4*Kp + CA, CW] rows = (T1, E1, T2, E2, each zero-padded to Kp rows, then W2)
    #                        with CW = C*A = D*B and W2[c*A+a, d*B+b] = W[a,b,c,d].
    # out_ref: [N, L, L]
    l1 = p_ref[0]                                  # [N*L, Kp]
    h1 = p_ref[1]
    l2 = p_ref[2]
    h2 = p_ref[3]

    # Static, sublane-aligned views into the packed constant slab (free).
    t1 = c_ref[0 * Kp:1 * Kp, :]                   # [Kp, CA]
    e1 = c_ref[1 * Kp:2 * Kp, :]
    t2 = c_ref[2 * Kp:3 * Kp, :]
    e2 = c_ref[3 * Kp:4 * Kp, :]
    w2 = c_ref[4 * Kp:4 * Kp + CA, :]              # [CA, DB]

    # X[r, c*A+a] = l1[r,a] * h1[r,c]   (expansion matmuls land directly in the
    # right lane layout; zero-padded rows/cols contribute nothing).
    x = (jnp.dot(l1, t1, preferred_element_type=jnp.float32) *
         jnp.dot(h1, e1, preferred_element_type=jnp.float32))          # [N*L, CA]
    # Y[r, d*B+b] = l2[r,b] * h2[r,d]
    y = (jnp.dot(l2, t2, preferred_element_type=jnp.float32) *
         jnp.dot(h2, e2, preferred_element_type=jnp.float32))          # [N*L, DB]

    # PW[r, d*B+b] = sum_{c,a} X[r, c*A+a] * W2[c*A+a, d*B+b]
    pw = jnp.dot(x, w2, preferred_element_type=jnp.float32)            # [N*L, DB]

    # out[n, i, j] = sum_k PW[n*L+i, k] * Y[n*L+j, k]
    # N is a tiny static Python int -> loop unrolls at trace time (no lane slicing).
    for n in range(N):
        pw_n = pw[n * L:(n + 1) * L, :]
        y_n = y[n * L:(n + 1) * L, :]
        out_n = jax.lax.dot_general(pw_n, y_n, (((1,), (1,)), ((), ())),
                                    preferred_element_type=jnp.float32)  # [L, L]
        out_ref[n, :, :] = out_n.astype(out_ref.dtype)


# ---------------------------------------------------------------------------
# Wrapper: packs operands, calls the kernel once (no grid).
# ---------------------------------------------------------------------------
def qriaffine_forward(layer1, layer2, layer3, h1, h2, h3, W, *, flag=True):
    """Forward of Qriaffine (factorize=False, 3-D path; layer3/h3 unused, kept for parity)."""
    N, L, _ = layer1.shape
    if flag:
        ones = jnp.ones((N, L, 1), layer1.dtype)
        layer1 = jnp.concatenate([layer1, ones], -1)
        layer2 = jnp.concatenate([layer2, ones], -1)
        layer3 = jnp.concatenate([layer3, ones], -1)   # parity only; DCE'd (unused)

    A, B, C, D = W.shape
    CA, DB = C * A, D * B
    # Packed-constant layout assumes a square slab; always true for the module's
    # flag=True config (B == C == D, A == in1+1 == in2+1 == B here).
    assert CA == DB, "packed constant slab requires C*A == D*B"
    # TODO(synk): general CA != DB layout, factorize=True branch and the 4-D
    # ('snia,...') branch of the reference module are alternate configs, not implemented.

    NL = N * L
    Kp = _round_up(max(A, B, C, D), 8)     # sublane-aligned row pitch for the constant slab

    # ---- packed constant slab: [4*Kp + CA, CA] --------------------------------
    T1 = _pad_rows_np(_tile_eye(A, C), Kp)        # [Kp, CA]
    E1 = _pad_rows_np(_block_expand(C, A), Kp)    # [Kp, CA]
    T2 = _pad_rows_np(_tile_eye(B, D), Kp)        # [Kp, DB]
    E2 = _pad_rows_np(_block_expand(D, B), Kp)    # [Kp, DB]
    W2 = jnp.transpose(W, (2, 0, 3, 1)).reshape(CA, DB)   # W2[c*A+a, d*B+b] = W[a,b,c,d]
    consts = jnp.concatenate(
        [jnp.asarray(np.concatenate([T1, E1, T2, E2], axis=0)), W2], axis=0)

    # ---- packed sequence tensor: [4, N*L, Kp] ---------------------------------
    def _pad_cols(x2d):
        return jnp.pad(x2d, ((0, 0), (0, Kp - x2d.shape[-1])))

    packed = jnp.stack([
        _pad_cols(layer1.reshape(NL, A)),
        _pad_cols(h1.reshape(NL, C)),
        _pad_cols(layer2.reshape(NL, B)),
        _pad_cols(h2.reshape(NL, D)),
    ], axis=0)

    kernel = functools.partial(qriaffine_kernel, N=N, L=L, Kp=Kp, CA=CA)

    flops = (4 * 2 * NL * Kp * CA          # four expansion matmuls
             + 2 * NL * CA * DB            # main contraction
             + 2 * N * L * L * DB)         # per-batch [L,L] finals
    bytes_accessed = 4 * (packed.size + consts.size + N * L * L)

    # Single invocation (no grid): one pipeline prologue, 2 input DMAs + 1 output DMA,
    # whole problem resident in VMEM (< 32 KiB — trivially within budget on v5e/v6e/v7x).
    out = pl.pallas_call(
        kernel,
        out_shape=jax.ShapeDtypeStruct((N, L, L), jnp.float32),
        cost_estimate=pl.CostEstimate(flops=int(flops), transcendentals=0,
                                      bytes_accessed=int(bytes_accessed)),
    )(packed, consts)
    return out


def xavier_normal_4d(key, shape):
    # Matches torch.nn.init.xavier_normal_ fan computation for >2-D tensors.
    receptive = int(np.prod(shape[2:])) if len(shape) > 2 else 1
    fan_in = shape[1] * receptive
    fan_out = shape[0] * receptive
    std = float(np.sqrt(2.0 / (fan_in + fan_out)))
    return jax.random.normal(key, shape, jnp.float32) * std


if __name__ == "__main__":
    # Module config: Qriaffine(input_size_1=7, input_size_2=7, input_size_3=16, init_std=0.25)
    # With flag=True the non-factorized W uses:
    #   input_size_1 = 7+1 = 8, input_size_2 = 7+1 = 8, input_size_3 = input_size_2 + 1 = 8
    # (the ctor arg input_size_3=16 only feeds input_size_4/5/6 of the factorize branch),
    # so W is [8, 8, 8, 8] and h1/h2 carry 8 features.
    in1, in2 = 7, 7
    A = in1 + 1
    B = in2 + 1
    C = D = in2 + 1
    N, L = 2, 8

    key = jax.random.PRNGKey(0)
    k_w, k1, k2, k3, kh1, kh2, kh3 = jax.random.split(key, 7)

    W = xavier_normal_4d(k_w, (A, B, C, D))                       # [8, 8, 8, 8]
    layer1 = jax.random.normal(k1, (N, L, in1), jnp.float32)      # [2, 8, 7]
    layer2 = jax.random.normal(k2, (N, L, in2), jnp.float32)      # [2, 8, 7]
    layer3 = jax.random.normal(k3, (N, L, in2), jnp.float32)      # unused in this path
    h1 = jax.random.normal(kh1, (N, L, C), jnp.float32)           # [2, 8, 8]
    h2 = jax.random.normal(kh2, (N, L, D), jnp.float32)           # [2, 8, 8]
    h3 = jax.random.normal(kh3, (N, L, D), jnp.float32)           # unused in this path

    out = qriaffine_forward(layer1, layer2, layer3, h1, h2, h3, W)
    out = jax.block_until_ready(out)

    # Pure-JAX reference (same semantics as the torch einsum path).
    ones = jnp.ones((N, L, 1), jnp.float32)
    l1c = jnp.concatenate([layer1, ones], -1)
    l2c = jnp.concatenate([layer2, ones], -1)
    ref = jnp.einsum('nia,abcd,njb,nic,njd->nij', l1c, W, l2c, h1, h2)
    np.testing.assert_allclose(np.asarray(out), np.asarray(ref),
                               rtol=1e-4, atol=1e-4)

    print("KERNEL_OK")
</pallas_src>

<mosaic_0001>
module attributes {stable_mosaic.version = 11 : i64} {
  func.func @qriaffine_kernel(%arg0: memref<4x16x8xf32, #tpu.memory_space<vmem>>, %arg1: memref<96x64xf32, #tpu.memory_space<vmem>>, %arg2: memref<2x8x8xf32, #tpu.memory_space<vmem>>) attributes {dimension_semantics = [], scalar_prefetch = 0 : i64, scratch_operands = 0 : i64, tpu.core_type = #tpu.core_type<tc>} {
    %c0 = arith.constant 0 : index
    %c0_0 = arith.constant 0 : index
    %c0_1 = arith.constant 0 : index
    %0 = vector.load %arg0[%c0, %c0_0, %c0_1] : memref<4x16x8xf32, #tpu.memory_space<vmem>>, vector<1x16x8xf32>
    %1 = vector.shape_cast %0 : vector<1x16x8xf32> to vector<16x8xf32>
    %c1 = arith.constant 1 : index
    %c0_2 = arith.constant 0 : index
    %c0_3 = arith.constant 0 : index
    %2 = vector.load %arg0[%c1, %c0_2, %c0_3] : memref<4x16x8xf32, #tpu.memory_space<vmem>>, vector<1x16x8xf32>
    %3 = vector.shape_cast %2 : vector<1x16x8xf32> to vector<16x8xf32>
    %c2 = arith.constant 2 : index
    %c0_4 = arith.constant 0 : index
    %c0_5 = arith.constant 0 : index
    %4 = vector.load %arg0[%c2, %c0_4, %c0_5] : memref<4x16x8xf32, #tpu.memory_space<vmem>>, vector<1x16x8xf32>
    %5 = vector.shape_cast %4 : vector<1x16x8xf32> to vector<16x8xf32>
    %c3 = arith.constant 3 : index
    %c0_6 = arith.constant 0 : index
    %c0_7 = arith.constant 0 : index
    %6 = vector.load %arg0[%c3, %c0_6, %c0_7] : memref<4x16x8xf32, #tpu.memory_space<vmem>>, vector<1x16x8xf32>
    %7 = vector.shape_cast %6 : vector<1x16x8xf32> to vector<16x8xf32>
    %c0_8 = arith.constant 0 : index
    %c0_9 = arith.constant 0 : index
    %8 = vector.load %arg1[%c0_8, %c0_9] : memref<96x64xf32, #tpu.memory_space<vmem>>, vector<8x64xf32>
    %c8 = arith.constant 8 : index
    %c0_10 = arith.constant 0 : index
    %9 = vector.load %arg1[%c8, %c0_10] : memref<96x64xf32, #tpu.memory_space<vmem>>, vector<8x64xf32>
    %c16 = arith.constant 16 : index
    %c0_11 = arith.constant 0 : index
    %10 = vector.load %arg1[%c16, %c0_11] : memref<96x64xf32, #tpu.memory_space<vmem>>, vector<8x64xf32>
    %c24 = arith.constant 24 : index
    %c0_12 = arith.constant 0 : index
    %11 = vector.load %arg1[%c24, %c0_12] : memref<96x64xf32, #tpu.memory_space<vmem>>, vector<8x64xf32>
    %c32 = arith.constant 32 : index
    %c0_13 = arith.constant 0 : index
    %12 = vector.load %arg1[%c32, %c0_13] : memref<96x64xf32, #tpu.memory_space<vmem>>, vector<64x64xf32>
    %cst = arith.constant dense<0.000000e+00> : vector<16x64xf32>
    %13 = tpu.matmul %1, %8, %cst {dimension_numbers = #tpu.dot_dimension_numbers<[1], [0], [0], [1], [0, 0, 1, 1], [], []>} : vector<16x8xf32>, vector<8x64xf32>, vector<16x64xf32> -> vector<16x64xf32>
    %cst_14 = arith.constant dense<0.000000e+00> : vector<16x64xf32>
    %14 = tpu.matmul %3, %9, %cst_14 {dimension_numbers = #tpu.dot_dimension_numbers<[1], [0], [0], [1], [0, 0, 1, 1], [], []>} : vector<16x8xf32>, vector<8x64xf32>, vector<16x64xf32> -> vector<16x64xf32>
    %15 = arith.mulf %13, %14 : vector<16x64xf32>
    %cst_15 = arith.constant dense<0.000000e+00> : vector<16x64xf32>
    %16 = tpu.matmul %5, %10, %cst_15 {dimension_numbers = #tpu.dot_dimension_numbers<[1], [0], [0], [1], [0, 0, 1, 1], [], []>} : vector<16x8xf32>, vector<8x64xf32>, vector<16x64xf32> -> vector<16x64xf32>
    %cst_16 = arith.constant dense<0.000000e+00> : vector<16x64xf32>
    %17 = tpu.matmul %7, %11, %cst_16 {dimension_numbers = #tpu.dot_dimension_numbers<[1], [0], [0], [1], [0, 0, 1, 1], [], []>} : vector<16x8xf32>, vector<8x64xf32>, vector<16x64xf32> -> vector<16x64xf32>
    %18 = arith.mulf %16, %17 : vector<16x64xf32>
    %cst_17 = arith.constant dense<0.000000e+00> : vector<16x64xf32>
    %19 = tpu.matmul %15, %12, %cst_17 {dimension_numbers = #tpu.dot_dimension_numbers<[1], [0], [0], [1], [0, 0, 1, 1], [], []>} : vector<16x64xf32>, vector<64x64xf32>, vector<16x64xf32> -> vector<16x64xf32>
    %20 = vector.extract_strided_slice %19 {offsets = [0, 0], sizes = [8, 64], strides = [1, 1]} : vector<16x64xf32> to vector<8x64xf32>
    %21 = vector.extract_strided_slice %18 {offsets = [0, 0], sizes = [8, 64], strides = [1, 1]} : vector<16x64xf32> to vector<8x64xf32>
    %cst_18 = arith.constant dense<0.000000e+00> : vector<8x8xf32>
    %22 = tpu.matmul %20, %21, %cst_18 {dimension_numbers = #tpu.dot_dimension_numbers<[1], [1], [0], [0], [0, 0, 1, 0], [], []>} : vector<8x64xf32>, vector<8x64xf32>, vector<8x8xf32> -> vector<8x8xf32>
    %c0_19 = arith.constant 0 : index
    %c0_20 = arith.constant 0 : index
    %c0_21 = arith.constant 0 : index
    %23 = vector.load %arg2[%c0_19, %c0_20, %c0_21] : memref<2x8x8xf32, #tpu.memory_space<vmem>>, vector<1x8x8xf32>
    %24 = vector.shape_cast %23 : vector<1x8x8xf32> to vector<8x8xf32>
    %25 = vector.shape_cast %22 : vector<8x8xf32> to vector<1x8x8xf32>
    tpu.vector_store %arg2[%c0_19, %c0_20, %c0_21], %25 {strides = array<i32>} : memref<2x8x8xf32, #tpu.memory_space<vmem>>, vector<1x8x8xf32>,
    %26 = vector.extract_strided_slice %19 {offsets = [8, 0], sizes = [8, 64], strides = [1, 1]} : vector<16x64xf32> to vector<8x64xf32>
    %27 = vector.extract_strided_slice %18 {offsets = [8, 0], sizes = [8, 64], strides = [1, 1]} : vector<16x64xf32> to vector<8x64xf32>
    %cst_22 = arith.constant dense<0.000000e+00> : vector<8x8xf32>
    %28 = tpu.matmul %26, %27, %cst_22 {dimension_numbers = #tpu.dot_dimension_numbers<[1], [1], [0], [0], [0, 0, 1, 0], [], []>} : vector<8x64xf32>, vector<8x64xf32>, vector<8x8xf32> -> vector<8x8xf32>
    %c1_23 = arith.constant 1 : index
    %c0_24 = arith.constant 0 : index
    %c0_25 = arith.constant 0 : index
    %29 = vector.load %arg2[%c1_23, %c0_24, %c0_25] : memref<2x8x8xf32, #tpu.memory_space<vmem>>, vector<1x8x8xf32>
    %30 = vector.shape_cast %29 : vector<1x8x8xf32> to vector<8x8xf32>
    %31 = vector.shape_cast %28 : vector<8x8xf32> to vector<1x8x8xf32>
    tpu.vector_store %arg2[%c1_23, %c0_24, %c0_25], %31 {strides = array<i32>} : memref<2x8x8xf32, #tpu.memory_space<vmem>>, vector<1x8x8xf32>,
    return
  }
}

</mosaic_0001>

<bundles_post_ra>
// kernel: tpu_custom_call.1
= control target key start
LH: loop header
LB: loop body
LE: loop exit
PB: predicated region body
PF: predicated region fallthrough
CT: control target
= control target key end

     0   :  { %vm35_vm0 = vcmask 64512   ;;  %s865_s0 = inlined_call_operand.vmem [shape: f32[4,16,8], index: 0, kind: input, shape index: {}]   ;;  %s866_s1 = inlined_call_operand.vmem [shape: f32[96,64], index: 1, kind: input, shape index: {}]   ;;  %s867_s2 = inlined_call_operand.hbm [shape: f32[2,8,8], index: 2, kind: output, shape index: {}]  }
   0x1   :  { %v23_v0 = vld [vmem:[%s866_s1] sm:$0xff]  ;;  %v13_v2 = vld [vmem:[%s865_s0 + $0x8] sm:$0xff]  ;;  %v617_v4 = vld [vmem:[%s865_s0 + $0x10] sm:$0xff] }
   0x2   :  { %v12_v1 = vld [vmem:[%s865_s0] sm:$0xff]  ;;  %663 = vmatprep.subr.mxu1 %v23_v0  ;;  %v24_v3 = vld [vmem:[%s866_s1 + $0x8] sm:$0xff]  ;;  %v25_v5 = vld [vmem:[%s866_s1 + $0x10] sm:$0xff] }
   0x3   :  { %665 = vmatprep.mubr.msk.f32.mxu1 %vm35_vm0, %v12_v1  ;;  %664 = vmatpush3.msra.mxu1 %v23_v0  ;;  %v26_v6 = vld [vmem:[%s866_s1 + $0x18] sm:$0xff]  ;;  %v619_v7 = vld [vmem:[%s865_s0 + $0x20] sm:$0xff]  ;;  %v28_v9 = vld [vmem:[%s866_s1 + $0x28] sm:$0xff] }
   0x4   :  { %666 = vmatmul.mubr.msk.f32.vlgmr.msra.gmra.mrb[0].mxu1 %vm35_vm0, %v13_v2  ;;  %668 = vmatprep.subr.mxu1 %v24_v3  ;;  %v27_v8 = vld [vmem:[%s866_s1 + $0x20] sm:$0xff]  ;;  %v618_v10 = vld [vmem:[%s865_s0 + $0x18] sm:$0xff]  ;;  %v29_v12 = vld [vmem:[%s866_s1 + $0x30] sm:$0xff] }
   0x5   :  { %669 = vmatpush3.msra.mxu1 %v24_v3  ;;  %670 = vmatprep.mubr.msk.f32.mxu1 %vm35_vm0, %v617_v4  ;;  %v712_v11 = vpack.c.bf16 %v28_v9, %v27_v8  ;;  %v621_v13 = vld [vmem:[%s865_s0 + $0x30] sm:$0xff]  ;;  %v30_v14 = vld [vmem:[%s866_s1 + $0x38] sm:$0xff] }
   0x6   :  { %673 = vmatprep.subr.mxu0 %v25_v5  ;;  %678 = vmatprep.subr.mxu1 %v26_v6 }
   0x7   :  { %7 = vsyncpa [#allocation3], 0  ;;  %674 = vmatpush3.msra.mxu0 %v25_v5  ;;  %675 = vmatprep.mubr.msk.f32.mxu0 %vm35_vm0, %v619_v7  ;;  %v620_v15 = vld [vmem:[%s865_s0 + $0x28] sm:$0xff]  ;;  %v716_v16 = vpack.c.bf16 %v30_v14, %v29_v12  ;;  %v622_v17 = vld [vmem:[%s865_s0 + $0x38] sm:$0xff]  ;;  %v757_v24 = vmov 0.0   ;;  %vm364_vm1 = vcmask 523264  }
   0x8   :  { %671 = vmatmul.mubr.msk.f32.vlgmr.msra.gmra.mrb[2].mxu1 %vm35_vm0, %v618_v10  ;;  %713 = vmatprep.subr.bf16.mxu0 %v712_v11  ;;  %v31_v18 = vld [vmem:[%s866_s1 + $0x40] sm:$0xff]  ;;  %v32_v19 = vld [vmem:[%s866_s1 + $0x48] sm:$0xff]  ;;  %v33_v21 = vld [vmem:[%s866_s1 + $0x50] sm:$0xff]  ;;  %vm758_vm2 = vmmov 0  }
   0x9   :  { %679 = vmatpush3.msra.mxu1 %v26_v6  ;;  %680 = vmatprep.mubr.msk.f32.mxu1 %vm35_vm0, %v621_v13  ;;  %v720_v20 = vpack.c.bf16 %v32_v19, %v31_v18  ;;  %v34_v22 = vld [vmem:[%s866_s1 + $0x58] sm:$0xff]  ;;  %s759_s1 = smov [#allocation2]  }
   0xa   :  { %676 = vmatmul.mubr.msk.f32.vlgmr.msra.gmra.mrb[0].mxu0 %vm35_vm0, %v620_v15  ;;  %v724_v23 = vpack.c.bf16 %v34_v22, %v33_v21  ;;  %702 = vmatprep.subr.mxu1 %v757_v24  ;;  %s606_s20 = sshll.u32 %s759_s1, 4  ;;  %s607_s20 = int_to_ptr.vmem [resolvable:$true] %s606_s20 }
   0xb   :  { %715 = vmatpush3.bf16.msra.mxu0 %v712_v11  ;;  %s733_s21 = scalar_lea.vmem %s607_s20, 256  ;;  %p738_p1 = scmp.lt.s32.totalorder %s607_s20, %s607_s20 }
   0xc   :  { %681 = vmatmul.mubr.msk.f32.vlgmr.msra.gmra.mrb[4].mxu1 %vm35_vm0, %v622_v17  ;;  %717 = vmatprep.subr.bf16.mxu0 %v716_v16  ;;  %p734_p0 = scmp.ne.s32.totalorder %s607_s20, %s733_s21  ;;  %p739_p2 = scmp.lt.s32.totalorder %s733_s21, %s733_s21 }
   0xd   :  { %704 = vmatprep.mubr.msk.f32.mxu1 %vm758_vm2, %v757_v24 }
   0xe   :  { %p740_p3 = por %p739_p2, %p738_p1 }
   0xf   :  { %719 = vmatpush3.bf16.msra.mxu0 %v716_v16 }
  0x10   :  { %721 = vmatprep.subr.bf16.mxu0 %v720_v20  ;;  %p741_p4 = pnand %p740_p3, %p734_p0 }
  0x13   :  { %723 = vmatpush3.bf16.msra.mxu0 %v720_v20 }
  0x14   :  { %725 = vmatprep.subr.bf16.mxu0 %v724_v23 }
  0x17   :  { %727 = vmatpush3.bf16.msra.mxu0 %v724_v23 }
  0xd7   :  { %v667_v25 = vpop.f32.mrb[0].mxu1 }
  0xd8   :  { %v108_v26 = vpop.f32.mrb[1].mxu1 }
  0xdb   :  { %v672_v27 = vpop.f32.mrb[2].mxu1 }
  0xdc   :  { %v199_v28 = vmul.f32 %v672_v27, %v667_v25  ;;  %v189_v29 = vpop.f32.mrb[3].mxu1 }
  0xdd   :  { %v198_v30 = vmul.f32 %v189_v29, %v108_v26  ;;  %v677_v31 = vpop.f32.mrb[0].mxu0 }
  0xde   :  { %v272_v32 = vpop.f32.mrb[1].mxu0 }
  0xdf   :  { %699 = vmatprep.mubr.msk.f32.mxu0 %vm364_vm1, %v198_v30  ;;  %v682_v33 = vpop.f32.mrb[4].mxu1 }
  0xe0   :  { %700 = vmatmul.mubr.msk.f32.vlgmr.msra.gmra.mrb[2].mxu0 %vm364_vm1, %v199_v28  ;;  %v363_v34 = vmul.f32 %v682_v33, %v677_v31  ;;  %v353_v35 = vpop.f32.mrb[5].mxu1 }
  0xe1   :  { %v362_v36 = vmul.f32 %v353_v35, %v272_v32 }
  0xe3   :  { %703 = vmatpush3.xpose.msk.msra.mxu1 %vm364_vm1, %v362_v36 }
  0xe4   :  { %707 = vmatprep.subr.mxu1 %v757_v24 }
 0x1b3   :  { %v701_v37 = vpop.f32.mrb[2].mxu0 }
 0x1b4   :  { %v437_v38 = vpop.f32.mrb[3].mxu0 }
 0x1b5   :  { %705 = vmatmul.mubr.msk.f32.vlgmr.msra.gmra.mrb[6].mxu1 %vm364_vm1, %v437_v38 }
 0x1b6   :  { %708 = vmatpush3.xpose.msk.msra.mxu1 %vm364_vm1, %v363_v34  ;;  %709 = vmatprep.mubr.msk.f32.mxu1 %vm758_vm2, %v757_v24 }
 0x1b9   :  { %710 = vmatmul.mubr.msk.f32.vlgmr.msra.gmra.mrb[8].mxu1 %vm364_vm1, %v701_v37 }
 0x288   :  { %v518_v39 = vpop.f32.mrb[6].mxu1 }
 0x289   :  { %522 = vst.msk [vmem:[#allocation2] sm:$0xff] %vm35_vm0, %v518_v39  ;;  %v706_v40 = vpop.f32.mrb[7].mxu1 }
 0x28c   :  { %v595_v41 = vpop.f32.mrb[8].mxu1 }
 0x28d   :  { %600 = vst.msk [vmem:[#allocation2 + $0x8] sm:$0xff] %vm35_vm0, %v595_v41  ;;  %v711_v42 = vpop.f32.mrb[9].mxu1 }
 0x28e   :  { %744 = shalt.err (!%p741_p4)
}
 0x28f   :  { %s745_s24 = scalar_lea.hbm %s867_s2, 256 }
 0x290   :  { %p746_p5 = scmp.ne.s32.totalorder %s867_s2, %s745_s24  ;;  %p749_p6 = scmp.lt.u32.totalorder %s745_s24, %s867_s2 }
 0x292   :  { %p751_p7 = pnand %p749_p6, %p746_p5 }
 0x294   :  { %754 = shalt.err (!%p751_p7)
}
 0x295   :  { %s760_s29 = smov 128   ;;  %s761_s30 = smov 8  }
 0x296   :  { %612 = dma.vmem_to_hbm [thread:$0]  %s607_s20, 256, %s867_s2, [#allocation3], %s760_s29, %s760_s29, %s761_s30  }
 0x297   :  { %755 = dma.done.wait [#allocation3], 256  }
 0x298   :  { %756 = vsyncadd [#allocation3], 4294967040 }
 0x299   :  { %616 = vsyncpa [#allocation3], 1 }

</bundles_post_ra>
